<compile_context>
chip_gen: v7x
topology: tpu7x:2x2x1
jax: 0.10.0
libtpu: 0.0.40
codegen_flags: <defaults>
</compile_context>

<pallas_src>
import functools

import numpy as np
import jax
import jax.numpy as jnp
from jax import lax
from jax.experimental import pallas as pl
from jax.experimental.pallas import tpu as pltpu


def _round_up(x, m):
    return (x + m - 1) // m * m


def _vmem_capacity_bytes():
    """Per-core VMEM capacity; falls back to the smallest current part (v7x, 64 MiB)."""
    try:
        return int(pltpu.get_tpu_info().vmem_capacity_bytes)
    except Exception:
        return 64 * 1024 * 1024


def _choose_tile(S, target):
    """Tokens per grid step: one tile if the sequence is short, otherwise a
    multiple of 128 that (when possible) divides the 128-padded sequence."""
    S8 = _round_up(S, 8)
    target = max(128, target // 128 * 128)
    if S8 <= target:
        return S8
    S128 = _round_up(S, 128)
    for cand in range(target, 127, -128):
        if S128 % cand == 0:
            return cand
    return target


def _choose_chunk(seq_tile, target=64):
    """Largest drain-chunk (multiple of 8, <= target) that divides the seq tile."""
    for c in range(min(seq_tile, target), 7, -8):
        if seq_tile % c == 0:
            return c
    return 8


# ---------------------------------------------------------------------------
# Fast path: table resident in VMEM, gather = chunked one-hot matmul (MXU).
# No per-row DMA descriptors, no dynamic sublane indexing.
# ---------------------------------------------------------------------------
def _embed_vmem_kernel(ids_t_ref, tok_ref, pos_ref, out_ref, acc_ref, *, v_chunk):
    # ids_t_ref : (Ts, B)       int32 token ids, transposed (block depends only on j)
    # tok_ref   : (V_pad, D_pad) embedding table, VMEM resident (constant block index)
    # pos_ref   : (Ts, D_pad)    positional slab for this seq tile
    # out_ref   : (Ts, D_pad)    output block (batch dim squeezed by the BlockSpec)
    # acc_ref   : (Ts, D_pad)    f32 accumulator scratch
    b = pl.program_id(1)
    seq_tile = ids_t_ref.shape[0]
    n_vchunks = tok_ref.shape[0] // v_chunk

    # Select this batch's id column with a compare+lane-reduce (no dynamic slicing).
    ids_bt = ids_t_ref[...]
    col = lax.broadcasted_iota(jnp.int32, ids_bt.shape, 1) == b
    ids_col = jnp.sum(jnp.where(col, ids_bt, 0), axis=1, keepdims=True)      # (Ts, 1)

    # Chunked one-hot matmul over the vocab (static unroll, static table slices).
    for c in range(n_vchunks):
        iota = lax.broadcasted_iota(jnp.int32, (seq_tile, v_chunk), 1) + c * v_chunk
        onehot = (ids_col == iota).astype(tok_ref.dtype)                     # (Ts, Vc)
        part = jnp.dot(onehot, tok_ref[pl.ds(c * v_chunk, v_chunk), :],
                       preferred_element_type=jnp.float32)
        if c == 0:
            acc_ref[...] = part
        else:
            acc_ref[...] += part

    out_ref[...] = (acc_ref[...] + pos_ref[...].astype(jnp.float32)).astype(out_ref.dtype)
    # TODO(synk): dropout omitted (eval-mode nn.Dropout is identity; torch RNG stream
    #             is not reproducible in Pallas).
    # TODO(synk): kv-cache positional offset (decode-time) not implemented; positions
    #             are always 0..S-1 as in the full-sequence forward.


# ---------------------------------------------------------------------------
# Fallback path: table stays in HBM, manual row-gather DMAs with per-chunk
# semaphores and a chunked drain fused with the positional add.
# ---------------------------------------------------------------------------
def _embed_hbm_kernel(ids_ref, tok_hbm, pos_ref, out_ref, gbuf, sems, *,
                      seq_tile, chunk, seq_pad, vocab):
    # ids_ref : SMEM (B*S_pad,) int32 token ids (scalar-prefetched, flattened 1D)
    # tok_hbm : (V, D_pad) embedding table left in HBM (manual row-gather DMAs)
    # pos_ref : (Ts, D_pad) positional slab
    # out_ref : (Ts, D_pad) output block (batch dim squeezed)
    # gbuf    : (Ts, D_pad) VMEM landing buffer for the gathered rows
    # sems    : (Ts // chunk,) DMA semaphores, one per drain chunk
    j = pl.program_id(0)
    b = pl.program_id(1)
    base = b * seq_pad + j * seq_tile
    n_chunks = seq_tile // chunk

    # Phase 1: issue every row gather up front so all transfers are in flight
    # before the first wait; chunk c's rows signal sems[c].
    for c in range(n_chunks):
        def _issue(r, carry, _c=c):
            i = _c * chunk + r
            tid = jnp.clip(ids_ref[base + i], 0, vocab - 1)      # guard OOB ids
            pltpu.make_async_copy(
                tok_hbm.at[pl.ds(tid, 1), :],
                gbuf.at[pl.ds(i, 1), :],
                sems.at[_c],
            ).start()
            return carry
        lax.fori_loop(0, chunk, _issue, 0, unroll=8)

    # Phase 2: drain chunk by chunk; fuse the positional add + lane-dense store so
    # the VPU/vst overlap with the remaining in-flight DMAs.
    for c in range(n_chunks):
        def _wait(r, carry, _c=c):
            pltpu.make_async_copy(
                tok_hbm.at[pl.ds(0, 1), :],        # same-shape descriptor: one row per wait
                gbuf.at[pl.ds(0, 1), :],
                sems.at[_c],
            ).wait()
            return carry
        lax.fori_loop(0, chunk, _wait, 0, unroll=8)

        sl = pl.ds(c * chunk, chunk)               # static, sublane-aligned slice
        out_ref[sl, :] = (gbuf[sl, :].astype(jnp.float32)
                          + pos_ref[sl, :].astype(jnp.float32)).astype(out_ref.dtype)
    # TODO(synk): cross-grid-step double-buffering of gbuf/sems (prefetch tile j+1's
    #             rows while adding tile j) and u32-packed gathers for bf16 tables
    #             are further wins left unimplemented.


def input_embedding(ids, tok_table, pos_table, *, seq_tile=None, force_hbm_gather=False):
    """ids: (B, S) int32; tok_table: (V, D); pos_table: (max_len, D) -> (B, S, D)."""
    B, S = ids.shape
    V, D = tok_table.shape
    L = pos_table.shape[0]
    assert S <= L, "sequence length exceeds max_len"

    dtype = tok_table.dtype
    t_item = jnp.dtype(dtype).itemsize
    p_item = jnp.dtype(pos_table.dtype).itemsize
    cap = _vmem_capacity_bytes()

    # Lane-dense padding of d_model (no-op for real models where D % 128 == 0).
    D_pad = _round_up(D, 128)

    # Tokens per grid step, re-derived per TPU generation (bigger on 128 MiB parts).
    if seq_tile is None:
        per_row = D_pad * (2 * p_item + 2 * t_item + max(4, t_item))
        cap_rows = max(128, (cap // 4) // per_row // 128 * 128)
        seq_tile = min(512 if cap >= (96 << 20) else 256, cap_rows)
    Ts = _choose_tile(S, seq_tile)
    S_pad = _round_up(S, Ts)
    num_tiles = S_pad // Ts
    grid = (num_tiles, B)            # batch innermost: pos slab / table never re-fetched

    # Positional slab (kept in its own dtype; the add is done in f32 in-kernel).
    pos_p = pos_table[:S]
    if (S_pad, D_pad) != (S, D):
        pos_p = jnp.pad(pos_p, ((0, S_pad - S), (0, D_pad - D)))

    out_shape = jax.ShapeDtypeStruct((B, S_pad, D_pad), dtype)
    dim_sem = ("parallel", "parallel")

    # VMEM-resident-table fast path when the (double-buffered) table fits a
    # per-generation budget (~16 MiB on 128 MiB parts, ~8 MiB on 64 MiB parts).
    table_budget = min(cap // 8, 16 << 20)
    use_vmem_table = (not force_hbm_gather) and (V * D_pad * t_item <= table_budget)

    if use_vmem_table:
        if _round_up(V, 8) <= 1024:
            v_chunk = V_pad = _round_up(V, 8)
        else:
            v_chunk = 1024
            V_pad = _round_up(V, v_chunk)
        tok_p = tok_table
        if (V_pad, D_pad) != (V, D):
            # TODO(synk): for production, pad the table once at init, not per call.
            tok_p = jnp.pad(tok_table, ((0, V_pad - V), (0, D_pad - D)))
        ids_t = jnp.pad(ids.astype(jnp.int32), ((0, 0), (0, S_pad - S))).T   # (S_pad, B)

        vmem_bytes = (2 * V_pad * D_pad * t_item          # table (double-buffered)
                      + 2 * Ts * D_pad * p_item           # pos slab
                      + 2 * Ts * D_pad * t_item           # out block
                      + 2 * Ts * B * 4                    # ids block
                      + Ts * D_pad * 4)                   # f32 accumulator
        out = pl.pallas_call(
            functools.partial(_embed_vmem_kernel, v_chunk=v_chunk),
            out_shape=out_shape,
            grid_spec=pltpu.PrefetchScalarGridSpec(
                num_scalar_prefetch=0,
                grid=grid,
                in_specs=[
                    pl.BlockSpec((Ts, B), lambda j, b: (j, 0)),          # ids (transposed)
                    pl.BlockSpec((V_pad, D_pad), lambda j, b: (0, 0)),   # table (resident)
                    pl.BlockSpec((Ts, D_pad), lambda j, b: (j, 0)),      # positional slab
                ],
                out_specs=pl.BlockSpec((None, Ts, D_pad), lambda j, b: (b, j, 0)),
                scratch_shapes=[pltpu.VMEM((Ts, D_pad), jnp.float32)],
            ),
            compiler_params=pltpu.CompilerParams(
                dimension_semantics=dim_sem,
                vmem_limit_bytes=int(min(cap, max(vmem_bytes + (8 << 20), 32 << 20))),
            ),
        )(ids_t, tok_p, pos_p)
    else:
        tok_p = tok_table
        if D_pad != D:
            # TODO(synk): for production, pad the table once at init, not per call.
            tok_p = jnp.pad(tok_table, ((0, 0), (0, D_pad - D)))
        ids_flat = jnp.pad(ids.astype(jnp.int32), ((0, 0), (0, S_pad - S))).reshape(-1)
        chunk = _choose_chunk(Ts)

        vmem_bytes = (2 * Ts * D_pad * p_item             # pos slab
                      + 2 * Ts * D_pad * t_item           # out block
                      + Ts * D_pad * t_item)              # gather landing buffer
        out = pl.pallas_call(
            functools.partial(_embed_hbm_kernel, seq_tile=Ts, chunk=chunk,
                              seq_pad=S_pad, vocab=V),
            out_shape=out_shape,
            grid_spec=pltpu.PrefetchScalarGridSpec(
                num_scalar_prefetch=1,                    # token ids -> SMEM (flat 1D)
                grid=grid,
                in_specs=[
                    pl.BlockSpec(memory_space=pl.ANY),                    # table in HBM
                    pl.BlockSpec((Ts, D_pad), lambda j, b, ids: (j, 0)),  # positional slab
                ],
                out_specs=pl.BlockSpec((None, Ts, D_pad), lambda j, b, ids: (b, j, 0)),
                scratch_shapes=[
                    pltpu.VMEM((Ts, D_pad), dtype),               # gather landing buffer
                    pltpu.SemaphoreType.DMA((Ts // chunk,)),      # per-chunk DMA semaphores
                ],
            ),
            compiler_params=pltpu.CompilerParams(
                dimension_semantics=dim_sem,
                vmem_limit_bytes=int(min(cap, max(vmem_bytes + (8 << 20), 32 << 20))),
            ),
        )(ids_flat, tok_p, pos_p)

    if (S_pad, D_pad) != (S, D):
        out = out[:, :S, :D]
    return out


def sinusoidal_pos_encoding(max_len, d_model, dtype=jnp.float32):
    """Standard sinusoidal positional encoding table (max_len, d_model)."""
    pos = np.arange(max_len, dtype=np.float64)[:, None]
    i = np.arange(0, d_model, 2, dtype=np.float64)[None, :]
    angle = pos / np.power(10000.0, i / d_model)
    pe = np.zeros((max_len, d_model), dtype=np.float64)
    pe[:, 0::2] = np.sin(angle)
    pe[:, 1::2] = np.cos(angle)
    return jnp.asarray(pe, dtype=dtype)


def _reference(ids, tok_table, pos_table):
    S = ids.shape[1]
    return jnp.take(tok_table, ids, axis=0) + pos_table[None, :S, :]


if __name__ == "__main__":
    key = jax.random.PRNGKey(0)

    # p_dropout would be 0.1 in the module; eval-mode dropout is identity.
    configs = [
        # fast path, single vocab chunk, padded d_model
        dict(B=2, S=8, V=64, D=32, L=16, kw={}),
        # fast path, 2 vocab chunks, 2 seq tiles, no padding / slicing
        dict(B=2, S=256, V=2048, D=128, L=256, kw=dict(seq_tile=128)),
        # HBM DMA-gather fallback path, 3 drain chunks
        dict(B=2, S=72, V=64, D=32, L=128, kw=dict(force_hbm_gather=True)),
    ]

    for n, cfg in enumerate(configs):
        key, k_ids, k_emb = jax.random.split(key, 3)
        tok = jax.random.normal(k_emb, (cfg["V"], cfg["D"]), dtype=jnp.float32)
        pos = sinusoidal_pos_encoding(cfg["L"], cfg["D"], dtype=jnp.float32)
        ids = jax.random.randint(k_ids, (cfg["B"], cfg["S"]), 0, cfg["V"], dtype=jnp.int32)

        out = jax.block_until_ready(input_embedding(ids, tok, pos, **cfg["kw"]))
        ref = _reference(ids, tok, pos)
        assert out.shape == (cfg["B"], cfg["S"], cfg["D"]), (n, out.shape)
        assert jnp.allclose(out, ref, atol=1e-5, rtol=1e-5), f"config {n} mismatch"

    print("KERNEL_OK")
</pallas_src>

<mosaic_0001>
module attributes {stable_mosaic.version = 11 : i64} {
  func.func @_embed_vmem_kernel(%arg0: i32, %arg1: i32, %arg2: memref<8x2xi32, #tpu.memory_space<vmem>>, %arg3: memref<64x128xf32, #tpu.memory_space<vmem>>, %arg4: memref<8x128xf32, #tpu.memory_space<vmem>>, %arg5: memref<1x8x128xf32, #tpu.memory_space<vmem>>, %arg6: memref<8x128xf32, #tpu.memory_space<vmem>>) attributes {dimension_semantics = [#tpu.dimension_semantics<parallel>, #tpu.dimension_semantics<parallel>], iteration_bounds = array<i64: 1, 2>, scalar_prefetch = 0 : i64, scratch_operands = 1 : i64, tpu.core_type = #tpu.core_type<tc>, window_params = [{transform_indices = @transform_0, window_bounds = array<i64: 8, 2>}, {pipeline_mode = #tpu.pipeline_mode<synchronous>, transform_indices = @transform_1, window_bounds = array<i64: 64, 128>}, {transform_indices = @transform_2, window_bounds = array<i64: 8, 128>}, {transform_indices = @transform_3, window_bounds = array<i64: 1, 8, 128>}]} {
    %c0 = arith.constant 0 : index
    %c0_0 = arith.constant 0 : index
    %0 = vector.load %arg2[%c0, %c0_0] : memref<8x2xi32, #tpu.memory_space<vmem>>, vector<8x2xi32>
    %1 = tpu.iota {dimensions = array<i32: 1>} : vector<8x2xi32>
    %2 = vector.broadcast %arg1 : i32 to vector<8x2xi32>
    %3 = arith.cmpi eq, %1, %2 : vector<8x2xi32>
    %c0_i32 = arith.constant 0 : i32
    %4 = vector.broadcast %c0_i32 : i32 to vector<8x2xi32>
    %5 = arith.select %3, %0, %4 : vector<8x2xi1>, vector<8x2xi32>
    %cst = arith.constant dense<0> : vector<8xi32>
    %6 = vector.multi_reduction <add>, %5, %cst [1] : vector<8x2xi32> to vector<8xi32>
    %7 = vector.shape_cast %6 : vector<8xi32> to vector<8x1xi32>
    %8 = tpu.iota {dimensions = array<i32: 1>} : vector<8x64xi32>
    %c0_i32_1 = arith.constant 0 : i32
    %9 = vector.broadcast %c0_i32_1 : i32 to vector<8x64xi32>
    %10 = arith.addi %8, %9 : vector<8x64xi32>
    %11 = vector.broadcast %7 : vector<8x1xi32> to vector<8x64xi32>
    %12 = arith.cmpi eq, %11, %10 : vector<8x64xi32>
    %13 = arith.extui %12 : vector<8x64xi1> to vector<8x64xi32>
    %14 = arith.sitofp %13 : vector<8x64xi32> to vector<8x64xf32>
    %c0_2 = arith.constant 0 : index
    %c0_3 = arith.constant 0 : index
    %15 = vector.load %arg3[%c0_2, %c0_3] : memref<64x128xf32, #tpu.memory_space<vmem>>, vector<64x128xf32>
    %cst_4 = arith.constant dense<0.000000e+00> : vector<8x128xf32>
    %16 = tpu.matmul %14, %15, %cst_4 {dimension_numbers = #tpu.dot_dimension_numbers<[1], [0], [0], [1], [0, 0, 1, 1], [], []>} : vector<8x64xf32>, vector<64x128xf32>, vector<8x128xf32> -> vector<8x128xf32>
    %c0_5 = arith.constant 0 : index
    %c0_6 = arith.constant 0 : index
    %17 = vector.load %arg6[%c0_5, %c0_6] : memref<8x128xf32, #tpu.memory_space<vmem>>, vector<8x128xf32>
    tpu.vector_store %arg6[%c0_5, %c0_6], %16 {strides = array<i32>} : memref<8x128xf32, #tpu.memory_space<vmem>>, vector<8x128xf32>,
    %c0_7 = arith.constant 0 : index
    %c0_8 = arith.constant 0 : index
    %18 = vector.load %arg6[%c0_7, %c0_8] : memref<8x128xf32, #tpu.memory_space<vmem>>, vector<8x128xf32>
    %c0_9 = arith.constant 0 : index
    %c0_10 = arith.constant 0 : index
    %19 = vector.load %arg4[%c0_9, %c0_10] : memref<8x128xf32, #tpu.memory_space<vmem>>, vector<8x128xf32>
    %20 = arith.addf %18, %19 : vector<8x128xf32>
    %c0_11 = arith.constant 0 : index
    %c0_12 = arith.constant 0 : index
    %c0_13 = arith.constant 0 : index
    %21 = vector.load %arg5[%c0_11, %c0_12, %c0_13] : memref<1x8x128xf32, #tpu.memory_space<vmem>>, vector<1x8x128xf32>
    %22 = vector.shape_cast %21 : vector<1x8x128xf32> to vector<8x128xf32>
    %23 = vector.shape_cast %20 : vector<8x128xf32> to vector<1x8x128xf32>
    tpu.vector_store %arg5[%c0_11, %c0_12, %c0_13], %23 {strides = array<i32>} : memref<1x8x128xf32, #tpu.memory_space<vmem>>, vector<1x8x128xf32>,
    return
  }
  func.func @transform_0(%arg0: i32, %arg1: i32) -> (i32, i32) {
    %c0_i32 = arith.constant 0 : i32
    %c0_i32_0 = arith.constant 0 : i32
    return %arg0, %c0_i32 : i32, i32
  }
  func.func @transform_1(%arg0: i32, %arg1: i32) -> (i32, i32) {
    %c0_i32 = arith.constant 0 : i32
    %c0_i32_0 = arith.constant 0 : i32
    %c0_i32_1 = arith.constant 0 : i32
    return %c0_i32, %c0_i32_0 : i32, i32
  }
  func.func @transform_2(%arg0: i32, %arg1: i32) -> (i32, i32) {
    %c0_i32 = arith.constant 0 : i32
    %c0_i32_0 = arith.constant 0 : i32
    return %arg0, %c0_i32 : i32, i32
  }
  func.func @transform_3(%arg0: i32, %arg1: i32) -> (i32, i32, i32) {
    %c0_i32 = arith.constant 0 : i32
    %c0_i32_0 = arith.constant 0 : i32
    return %arg1, %arg0, %c0_i32 : i32, i32, i32
  }
}

</mosaic_0001>

<bundles_post_ra>
// kernel: tpu_custom_call.1
= control target key start
LH: loop header
LB: loop body
LE: loop exit
PB: predicated region body
PF: predicated region fallthrough
CT: control target
= control target key end

     0   :  { %8 = vsyncpa [#allocation4], 0  ;;  %s852_s0 = inlined_call_operand.vmem [shape: s32[8,2], index: 0, kind: input, shape index: {}]   ;;  %s853_s1 = inlined_call_operand.hbm [shape: f32[64,128], index: 1, kind: input, shape index: {}]   ;;  %s854_s2 = inlined_call_operand.vmem [shape: f32[8,128], index: 2, kind: input, shape index: {}]   ;;  %s855_s3 = inlined_call_operand.hbm [shape: f32[2,8,128], index: 3, kind: output, shape index: {}]  }
   0x1   :  { %9 = vsyncpa [#allocation5], 0 }
   0x2   :  { %11 = vsyncpa [#allocation5 + $0x1], 0  ;;  %s700_s12 = smov 0   ;;  %s702_s13 = smov 0  }
   0x3   :  { %s704_s14 = smov 0   ;;  %s706_s15 = smov 0  }
   0x4   :  { %s708_s16 = smov 0   ;;  %s710_s17 = smov 0  }
   0x5 LB: > { %s435_s18 = sadd.s32 4294967295, %s671_s17   ;;  %s436_s19 = sadd.s32 4294967294, %s671_s17   ;;  %s671_s17 = sphi %s710_s17, %s17_s17   ;;  %s667_s16 = sphi %s708_s16, %s873_s16   ;;  %s663_s15 = sphi %s706_s15, %s872_s15   ;;  %s659_s14 = sphi %s704_s14, %s871_s14   ;;  %s655_s13 = sphi %s702_s13, %s870_s13   ;;  %s651_s12 = sphi %s700_s12, %s869_s12  }
   0x6   : > { %s26_s20 = sadd.s32 1, %s667_s16  ;;  %s111_s21 = sadd.s32 1, %s659_s14 }
   0x7   : > { %p27_p0 = scmp.ge.s32.totalorder %s26_s20, 2  ;;  %p121_p1 = scmp.ne.s32.totalorder %s659_s14, %s655_s13 }
   0x8   : > { %p122_p2 = scmp.eq.s32.totalorder %s435_s18, 1  ;;  %p127_p3 = scmp.ne.s32.totalorder %s655_s13, %s651_s12 }
   0x9   : > { %s875_s20 = smov (%p27_p0, %s26_s20), 0  ;;  %p128_p5 = scmp.eq.s32.totalorder %s436_s19, 1 }
   0xa   : > { %p740_p4 = por %p122_p2, %p121_p1  ;;  %s106_s23 = ssub.s32 %s667_s16, %s875_s20 }
   0xb   : > { %p437_p6 = scmp.ge.s32.totalorder %s671_s17, 1  ;;  %p109_p7 = scmp.eq.s32.totalorder %s106_s23, 0 }
   0xc   : > { %s860_s22 = scalar_select %p740_p4, 1, 0 }
   0xd   : > { %p747_p8 = por %p128_p5, %p127_p3  ;;  %p135_p9 = scmp.lt.s32.totalorder %s671_s17, 3 }
   0xe   : > { %s753_s25 = scalar_select %p109_p7, %s659_s14, %s111_s21  }
   0xf   : > { %s861_s24 = scalar_select %p747_p8, 1, 0 }
  0x10   : > { %p755_p10 = pnand %p437_p6, %p135_p9  ;;  %p759_p11 = scmp.eq.s32.totalorder %s435_s18, 0 }
  0x11   : > { %s673_s28 = smov [#allocation3]   ;;  %s561_s6 = scalar_lea.hbm %s853_s1, 1024 }
  0x12   : > { %s862_s26 = scalar_select %p755_p10, 1, 0 }
  0x13   : > { %s863_s27 = scalar_select %p759_p11, 1, 0 }
  0x14   : > { %p496_p12 = pneg %p755_p10  ;;  %s154_s29 = sshll.u32 %s673_s28, 4  ;;  %s155_s29 = int_to_ptr.vmem [resolvable:$true] %s154_s29 }
  0x15   : > { %p562_p0 = scmp.ne.s32.totalorder %s853_s1, %s561_s6  ;;  %p568_p5 = scmp.lt.u32.totalorder %s561_s6, %s853_s1 }
  0x16   : > { %p767_p13 = pnand %p759_p11, %p496_p12 }
  0x18   : > { %p563_p1 = pneg %p767_p13 }
  0x1a   : > { %p564_p2 = pnand %p563_p1, %p562_p0 }
  0x1c   : > { %p565_p3 = pneg %p564_p2 }
  0x1e   : > { %p570_p6 = pnand %p568_p5, %p565_p3 }
  0x20   : > { %573 = shalt.err (!%p570_p6)
}
  0x21   : > { %s574_s11 = scalar_lea.vmem %s155_s29, 1024  ;;  %p582_p8 = scmp.lt.s32.totalorder %s155_s29, %s155_s29 }
  0x22   : > { %p575_p7 = scmp.ne.s32.totalorder %s155_s29, %s574_s11  ;;  %p583_p4 = scmp.lt.s32.totalorder %s574_s11, %s574_s11 }
  0x24   : > { %p577_p9 = pnand %p575_p7, %p563_p1  ;;  %p584_p11 = por %p583_p4, %p582_p8 }
  0x26   : > { %p578_p12 = pneg %p577_p9 }
  0x28   : > { %p585_p10 = pnand %p584_p11, %p578_p12 }
  0x2a   : > { %588 = shalt.err (!%p585_p10)
}
  0x2b   : > { %s674_s18 = smov 128   ;;  %s675_s19 = smov 8  }
  0x2c   : > { %499 = dma.hbm_to_vmem [thread:$0]  (!%p767_p13), %s853_s1, 1024, %s155_s29, [#allocation4], %s674_s18, %s674_s18, %s675_s19  }
  0x2d   : > { %p865_p0 = scmp.ne.s32.totalorder %s862_s26, 0 }
  0x2e   : > { %p866_p2 = scmp.ne.s32.totalorder (!%p865_p0), %s863_s27, 0 }
  0x2f   : > { %177 = sbr.rel (%p865_p0) target bundleno = 446 (0x1be), region = 32 }
  0x36   : > { %642 = dma.done.wait (%p866_p2), [#allocation4], 1024  }
  0x37   : > { %644 = vsyncadd (%p866_p2), [#allocation4], 4294966272  ;;  %v213_v0 = vlaneseq  ;;  %v676_v1 = vmov 0.0|0.0   ;;  %v215_v3 = vstv %s663_s15  ;;  %vm218_vm1 = vcmask 15360   ;;  %v212_v4 = vld [vmem:[%s852_s0] sm:$0xff]  ;;  %v235_v5 = vld [vmem:[#allocation3] sm:$0xff] }
  0x38   : > { %478 = vmatprep.subr.bf16.mxu0 %v676_v1  ;;  %v236_v6 = vld [vmem:[#allocation3 + $0x8] sm:$0xff]  ;;  %v237_v9 = vld [vmem:[#allocation3 + $0x10] sm:$0xff]  ;;  %v238_v10 = vld [vmem:[#allocation3 + $0x18] sm:$0xff]  ;;  %vm677_vm2 = vmmov 0   ;;  %v678_v23 = vmov 0.0   ;;  %vm243_vm3 = vcmask 523264  }
  0x39   : > { %v214_v2 = vand.u32 127, %v213_v0  ;;  %v479_v8 = vpack.c.bf16 %v236_v6, %v235_v5  ;;  %v482_v14 = vpack.c.bf16 %v238_v10, %v237_v9  ;;  %v239_v17 = vld [vmem:[#allocation3 + $0x20] sm:$0xff]  ;;  %v240_v18 = vld [vmem:[#allocation3 + $0x28] sm:$0xff]  ;;  %v241_v20 = vld [vmem:[#allocation3 + $0x30] sm:$0xff]  ;;  %475 = vmatprep.mubr.msk.f32.mxu0 %vm677_vm2, %v678_v23  ;;  %s201_s26 = sand.u32 1, %s655_s13   ;;  %s447_s5 = sshll.u32 %s663_s15, 7 }
  0x3a   : > { %v485_v19 = vpack.c.bf16 %v240_v18, %v239_v17  ;;  %v242_v21 = vld [vmem:[#allocation3 + $0x38] sm:$0xff]  ;;  %s443_s27 = sshll.u32 %s201_s26, 3  ;;  %v319_v31 = vld [vmem:[%s854_s2] sm:$0xff]  ;;  %s805_s10 = scalar_lea.hbm %s855_s3, %s447_s5 }
  0x3b   : > { %vm216_vm0 = vcmp.eq.s32.totalorder %v214_v2, %v215_v3  ;;  %480 = vmatpush3.bf16.msra.mxu0 %v479_v8  ;;  %v488_v22 = vpack.c.bf16 %v242_v21, %v241_v20  ;;  %s203_s6 = scalar_lea.vmem [#allocation6], %s443_s27  ;;  %s323_s11 = scalar_lea.sflag [#allocation5], %s201_s26 }
  0x3c   : > { %v217_v7 = vsel %vm216_vm0, %v212_v4, 0  ;;  %481 = vmatprep.subr.bf16.mxu0 %v676_v1  ;;  %s337_s7 = sshll.u32 %s203_s6, 4  ;;  %p867_p8 = scmp.ne.s32.totalorder %s860_s22, 0  ;;  %s807_s7 = int_to_ptr.vmem [resolvable:$true] %s337_s7 }
  0x3d   : > { %v219_v11 = vsel %vm218_vm1, %v217_v7, 0  ;;  %s589_s18 = scalar_lea.vmem %s807_s7, 128  ;;  %s679_s15 = smov [#allocation6]  }
  0x3e   : > { %v221_v12 = vshrl.u32 %v219_v11, 16  ;;  %v220_v13 = vand.u32 65535, %v219_v11  ;;  %p590_p4 = scmp.ne.s32.totalorder %s807_s7, %s589_s18  ;;  %s593_s19 = sshll.u32 %s679_s15, 4  ;;  %s594_s19 = int_to_ptr.vmem [resolvable:$false] %s593_s19 }
  0x3f   : > { %483 = vmatpush3.bf16.msra.mxu0 %v482_v14  ;;  %s595_s21 = scalar_lea.vmem %s594_s19, 256  ;;  %p596_p13 = scmp.lt.s32.totalorder %s807_s7, %s594_s19 }
  0x40   : > { %v223_v15 = vcvt.s32.f32 %v221_v12  ;;  %v222_v16 = vcvt.s32.f32 %v220_v13  ;;  %484 = vmatprep.subr.bf16.mxu0 %v676_v1  ;;  %p591_p10 = pnand %p590_p4, %p867_p8  ;;  %p597_p1 = scmp.lt.s32.totalorder %s595_s21, %s589_s18 }
  0x42   : > { %226 = vadd.xlane.f32.xlu0 %v223_v15  ;;  %p592_p11 = pneg %p591_p10  ;;  %p598_p3 = por %p597_p1, %p596_p13 }
  0x43   : > { %486 = vmatpush3.bf16.msra.mxu0 %v485_v19 }
  0x44   : > { %487 = vmatprep.subr.bf16.mxu0 %v676_v1  ;;  %p599_p5 = pnand %p598_p3, %p592_p11 }
  0x46   : > { %224 = vadd.xlane.f32.xlu0 %v222_v16 }
  0x47   : > { %489 = vmatpush3.bf16.msra.mxu0 %v488_v22 }
  0xcf   : > { %v227_v24 = vpop.xlane.xlu0 %226 }
  0xd0   : > { %v229_v25 = vcvt.f32.s32 %v227_v24 }
  0xd2   : > { %v230_v27 = vshll.u32 %v229_v25, 16 }
  0xd3   : > { %v225_v26 = vpop.xlane.xlu0 %224 }
  0xd4   : > { %v228_v28 = vcvt.f32.s32 %v225_v26 }
  0xd6   : > { %v231_v29 = vadd.s32 %v230_v27, %v228_v28 }
  0xd8   : > { %vm232_vm4 = vcmp.eq.s32.totalorder %v231_v29, %v214_v2 }
  0xd9   : > { %v444_v30 = vsel %vm232_vm4, 1.0, %v678_v23 }
  0xda   : > { %476 = vmatmul.mubr.msk.f32.vlgmr.msra.gmra.mrb[0].mxu0 %vm243_vm3, %v444_v30 }
 0x1ad   : > { %v313_v32 = vpop.f32.mrb[0].mxu0 }
 0x1ae   : > { %v320_v33 = vadd.f32 %v319_v31, %v313_v32  ;;  %v477_v34 = vpop.f32.mrb[1].mxu0 }
 0x1b0   : > { %321 = vst [vmem:[%s203_s6] sm:$0xff] %v320_v33 }
 0x1b1   : > { %602 = shalt.err (!%p599_p5)
}
 0x1b2   : > { %s603_s23 = scalar_lea.hbm %s805_s10, 128  ;;  %s607_s26 = scalar_lea.hbm %s855_s3, 256 }
 0x1b3   : > { %p604_p6 = scmp.ne.s32.totalorder %s805_s10, %s603_s23  ;;  %p608_p12 = scmp.lt.u32.totalorder %s805_s10, %s855_s3 }
 0x1b4   : > { %p609_p0 = scmp.lt.u32.totalorder %s607_s26, %s603_s23  ;;  %p611_p4 = scmp.lt.u32.totalorder %s603_s23, %s805_s10 }
 0x1b5   : > { %p605_p7 = pnand %p604_p6, %p867_p8 }
 0x1b6   : > { %p610_p2 = por %p609_p0, %p608_p12 }
 0x1b7   : > { %p606_p9 = pneg %p605_p7 }
 0x1b8   : > { %p612_p10 = por %p611_p4, %p610_p2 }
 0x1ba   : > { %p613_p11 = pnand %p612_p10, %p606_p9 }
 0x1bc   : > { %616 = shalt.err (!%p613_p11)
}
 0x1bd   : > { %494 = dma.vmem_to_hbm [thread:$0]  (%p867_p8), %s807_s7, 128, %s805_s10, %s323_s11  }
 0x1be PF: > { %p506_p13 = scmp.ge.s32.totalorder %s671_s17, 2  ;;  %s349_s4 = sand.u32 1, %s651_s12  }
 0x1bf   : > { %p868_p1 = scmp.ne.s32.totalorder %s861_s24, 0  ;;  %s350_s5 = scalar_lea.sflag [#allocation5], %s349_s4 }
 0x1c1   : > { %p501_p3 = pnand %p506_p13, %p868_p1 }
 0x1c3   : > { %646 = dma.done.wait (!%p501_p3), %s350_s5, 128  }
 0x1c4   : > { %648 = vsyncadd (!%p501_p3), %s350_s5, 4294967168  ;;  %s17_s17 = sadd.s32 1, %s671_s17   ;;  %s869_s12 = smov %s655_s13 }
 0x1c5   : > { %p14_p5 = scmp.ge.s32.totalorder %s17_s17, 4   ;;  %s870_s13 = smov %s659_s14 }
 0x1c6   : > { %s871_s14 = smov %s753_s25  ;;  %s872_s15 = smov %s667_s16 }
 0x1c7   : > { %s873_s16 = smov %s875_s20  ;;  %16 = sbr.rel (!%p14_p5) target bundleno = 5 (0x5), region = 75 }
 0x1ce   :  { %355 = vsyncpa [#allocation4], 1 }
 0x1cf   :  { %357 = vsyncpa [#allocation4 + $0x1], 1 }
 0x1d0   :  { %358 = vsyncpa [#allocation5], 1 }
 0x1d1   :  { %360 = vsyncpa [#allocation5 + $0x1], 1 }

</bundles_post_ra>
